<compile_context>
chip_gen: v7x
topology: tpu7x:2x2x1
jax: 0.10.0
libtpu: 0.0.40
codegen_flags: <defaults>
</compile_context>

<pallas_src>
import jax
import jax.numpy as jnp
from jax.experimental import pallas as pl
from jax.experimental.pallas import tpu as pltpu


# Conservative, generation-portable VMEM numbers.
_VMEM_LIMIT_BYTES = 32 << 20   # explicit scoped-VMEM limit (fits v7x physical, raises v5e default)
_VMEM_BUDGET_BYTES = 20 << 20  # working-set budget we size tiles against (headroom under the limit)
_MAX_TILE_B = 1024             # mem-bound sweet spot (>=85% of HBM roofline in measured sweeps)


def _linear_kernel(x_ref, w_ref, b_ref, o_ref):
    # x_ref: (TILE_B, D), w_ref: (D, O)  -- canonical (M,K)x(K,N) MXU contraction.
    # b_ref: (1, O), o_ref: (TILE_B, O). f32 accumulation, bias add in f32.
    acc = jax.lax.dot_general(
        x_ref[...], w_ref[...],
        dimension_numbers=(((1,), (0,)), ((), ())),
        preferred_element_type=jnp.float32,
    )
    o_ref[...] = (acc + b_ref[...]).astype(o_ref.dtype)


def prepare_linear_params(weight, bias):
    """One-time layout work: PyTorch (O, D) weight -> (D, O); bias -> (1, O)."""
    return weight.T, bias.reshape(1, -1)


def _derive_tile_b(D, O, itemsize):
    """Largest sublane-aligned batch tile whose double-buffered working set
    (x tile + out tile, plus the default-double-buffered resident weight/bias)
    stays inside the cross-generation VMEM budget."""
    resident = 2 * (D * O + O) * itemsize          # weight + bias blocks (x2 buffers)
    per_row = 2 * (D + O) * itemsize               # double-buffered x row + out row
    cap = max((_VMEM_BUDGET_BYTES - resident) // per_row, 8)
    tile = min(_MAX_TILE_B, cap)
    return max(8, (tile // 8) * 8)


def logistic_regression_forward(x, w_t, b2d):
    """y = x @ w_t + b2d, with w_t = weight.T (D, O) and b2d = bias (1, O)."""
    B, D = x.shape
    D2, O = w_t.shape
    assert D == D2, "weight / input feature-dim mismatch"
    assert b2d.shape == (1, O), "bias must be pre-reshaped to (1, O)"

    itemsize = jnp.dtype(x.dtype).itemsize
    TILE_B = _derive_tile_b(D, O, itemsize)

    out_shape = jax.ShapeDtypeStruct((B, O), x.dtype)

    if B <= TILE_B:
        # Single shot: no grid, no pipeline bookkeeping — whole operands in VMEM.
        return pl.pallas_call(
            _linear_kernel,
            out_shape=out_shape,
            in_specs=[
                pl.BlockSpec(memory_space=pltpu.MemorySpace.VMEM),
                pl.BlockSpec(memory_space=pltpu.MemorySpace.VMEM),
                pl.BlockSpec(memory_space=pltpu.MemorySpace.VMEM),
            ],
            out_specs=pl.BlockSpec(memory_space=pltpu.MemorySpace.VMEM),
            compiler_params=pltpu.CompilerParams(
                vmem_limit_bytes=_VMEM_LIMIT_BYTES,
            ),
        )(x, w_t, b2d)

    # Tiled over batch; weight/bias stay VMEM-resident across the grid.
    # grid = cdiv(B, TILE_B): the ragged tail block is clamped by Pallas, so
    # no rows of zeros are DMA'd or matmul'd and no wrapper-side B padding.
    num_tiles = pl.cdiv(B, TILE_B)
    return pl.pallas_call(
        _linear_kernel,
        out_shape=out_shape,
        grid=(num_tiles,),
        in_specs=[
            pl.BlockSpec((TILE_B, D), lambda i: (i, 0)),   # x tile (full-extent D)
            pl.BlockSpec((D, O), lambda i: (0, 0)),        # resident weight
            pl.BlockSpec((1, O), lambda i: (0, 0)),        # resident bias
        ],
        out_specs=pl.BlockSpec((TILE_B, O), lambda i: (i, 0)),
        compiler_params=pltpu.CompilerParams(
            dimension_semantics=("parallel",),             # megacore over batch tiles
            vmem_limit_bytes=_VMEM_LIMIT_BYTES,
        ),
    )(x, w_t, b2d)


if __name__ == "__main__":
    key = jax.random.PRNGKey(0)
    k_x, k_w, k_b, k_x2 = jax.random.split(key, 4)

    # Small shapes consistent with the module.
    batch, input_dim, output_dim = 8, 32, 16

    x = jax.random.normal(k_x, (batch, input_dim), dtype=jnp.float32)
    # Deterministic "Kaiming-uniform-like" init (same shapes as nn.Linear).
    bound = 1.0 / jnp.sqrt(jnp.float32(input_dim))
    weight = jax.random.uniform(
        k_w, (output_dim, input_dim), minval=-bound, maxval=bound,
        dtype=jnp.float32)
    bias = jax.random.uniform(
        k_b, (output_dim,), minval=-bound, maxval=bound, dtype=jnp.float32)

    # One-time layout work (hoisted out of the forward).
    w_t, b2d = prepare_linear_params(weight, bias)

    fwd = jax.jit(logistic_regression_forward)

    # 1) Toy batch (single-tile / grid-less path).
    y = jax.block_until_ready(fwd(x, w_t, b2d))
    y_ref = x @ weight.T + bias
    assert y.shape == (batch, output_dim)
    assert jnp.allclose(y, y_ref, atol=1e-5, rtol=1e-5)

    # 2) Larger batch, not a multiple of the tile or of 8: exercises the
    #    tiled "parallel" grid path and the clamped ragged tail block.
    big_batch = 2500
    x2 = jax.random.normal(k_x2, (big_batch, input_dim), dtype=jnp.float32)
    y2 = jax.block_until_ready(fwd(x2, w_t, b2d))
    y2_ref = x2 @ weight.T + bias
    assert y2.shape == (big_batch, output_dim)
    assert jnp.allclose(y2, y2_ref, atol=1e-5, rtol=1e-5)

    print("KERNEL_OK")
</pallas_src>

<mosaic_0001>
module attributes {stable_mosaic.version = 11 : i64} {
  func.func @_linear_kernel(%arg0: memref<8x32xf32, #tpu.memory_space<vmem>>, %arg1: memref<32x16xf32, #tpu.memory_space<vmem>>, %arg2: memref<1x16xf32, #tpu.memory_space<vmem>>, %arg3: memref<8x16xf32, #tpu.memory_space<vmem>>) attributes {dimension_semantics = [], scalar_prefetch = 0 : i64, scratch_operands = 0 : i64, tpu.core_type = #tpu.core_type<tc>} {
    %c0 = arith.constant 0 : index
    %c0_0 = arith.constant 0 : index
    %0 = vector.load %arg0[%c0, %c0_0] : memref<8x32xf32, #tpu.memory_space<vmem>>, vector<8x32xf32>
    %c0_1 = arith.constant 0 : index
    %c0_2 = arith.constant 0 : index
    %1 = vector.load %arg1[%c0_1, %c0_2] : memref<32x16xf32, #tpu.memory_space<vmem>>, vector<32x16xf32>
    %cst = arith.constant dense<0.000000e+00> : vector<8x16xf32>
    %2 = tpu.matmul %0, %1, %cst {dimension_numbers = #tpu.dot_dimension_numbers<[1], [0], [0], [1], [0, 0, 1, 1], [], []>} : vector<8x32xf32>, vector<32x16xf32>, vector<8x16xf32> -> vector<8x16xf32>
    %c0_3 = arith.constant 0 : index
    %c0_4 = arith.constant 0 : index
    %3 = vector.load %arg2[%c0_3, %c0_4] : memref<1x16xf32, #tpu.memory_space<vmem>>, vector<1x16xf32>
    %4 = vector.broadcast %3 : vector<1x16xf32> to vector<8x16xf32>
    %5 = arith.addf %2, %4 : vector<8x16xf32>
    %c0_5 = arith.constant 0 : index
    %c0_6 = arith.constant 0 : index
    %6 = vector.load %arg3[%c0_5, %c0_6] : memref<8x16xf32, #tpu.memory_space<vmem>>, vector<8x16xf32>
    tpu.vector_store %arg3[%c0_5, %c0_6], %5 {strides = array<i32>} : memref<8x16xf32, #tpu.memory_space<vmem>>, vector<8x16xf32>,
    return
  }
}

</mosaic_0001>

<bundles_post_ra>
// kernel: logistic_regression_forward.1
= control target key start
LH: loop header
LB: loop body
LE: loop exit
PB: predicated region body
PF: predicated region fallthrough
CT: control target
= control target key end

     0   :  { %v169_v3 = vmov 0.0|0.0   ;;  %vm170_vm0 = vmmov 0   ;;  %v171_v6 = vmov 0.0   ;;  %s223_s0 = inlined_call_operand.vmem [shape: f32[8,32], index: 0, kind: input, shape index: {}]   ;;  %s224_s1 = inlined_call_operand.vmem [shape: f32[32,16], index: 1, kind: input, shape index: {}]   ;;  %s225_s2 = inlined_call_operand.vmem [shape: f32[1,16], index: 2, kind: input, shape index: {}]   ;;  %s226_s3 = inlined_call_operand.hbm [shape: f32[8,16], index: 3, kind: output, shape index: {}]  }
   0x1   :  { %v16_v0 = vld [vmem:[%s224_s1] sm:$0xff]  ;;  %v17_v1 = vld [vmem:[%s224_s1 + $0x8] sm:$0xff]  ;;  %v18_v2 = vld [vmem:[%s224_s1 + $0x10] sm:$0xff]  ;;  %135 = vmatprep.subr.bf16.mxu0 %v169_v3  ;;  %132 = vmatprep.mubr.msk.f32.mxu0 %vm170_vm0, %v171_v6 }
   0x2   :  { %v136_v4 = vpack.c.bf16 %v17_v1, %v16_v0  ;;  %v19_v5 = vld [vmem:[%s224_s1 + $0x18] sm:$0xff] }
   0x3   :  { %8 = vsyncpa [#allocation3], 0  ;;  %v139_v7 = vpack.c.bf16 %v19_v5, %v18_v2  ;;  %v15_v8 = vld [vmem:[%s223_s0] sm:$0xff]  ;;  %vm27_vm1 = vcmask 261120   ;;  %s172_s24 = smov [#allocation2]   ;;  %vm101_vm2 = vcmask 130048  }
   0x4   :  { %137 = vmatpush3.bf16.msra.mxu0 %v136_v4  ;;  %v117_v9 = vld [vmem:[%s225_s2] ss:$0 sm:$0xff]  ;;  %s109_s1 = sshll.u32 %s172_s24, 4  ;;  %s110_s1 = int_to_ptr.vmem [resolvable:$true] %s109_s1 }
   0x5   :  { %138 = vmatprep.subr.bf16.mxu0 %v169_v3  ;;  %s145_s25 = scalar_lea.vmem %s110_s1, 128  ;;  %p150_p1 = scmp.lt.s32.totalorder %s110_s1, %s110_s1 }
   0x6   :  { %p146_p0 = scmp.ne.s32.totalorder %s110_s1, %s145_s25  ;;  %p151_p2 = scmp.lt.s32.totalorder %s145_s25, %s145_s25 }
   0x8   :  { %140 = vmatpush3.bf16.msra.mxu0 %v139_v7  ;;  %p152_p3 = por %p151_p2, %p150_p1 }
   0xa   :  { %p153_p4 = pnand %p152_p3, %p146_p0 }
   0xb   :  { %133 = vmatmul.mubr.msk.f32.vlgmr.msra.gmra.mrb[0].mxu0 %vm27_vm1, %v15_v8 }
  0xde   :  { %v97_v10 = vpop.f32.mrb[0].mxu0 }
  0xdf   :  { %v98_v11 = vadd.f32 %v117_v9, %v97_v10  ;;  %v134_v12 = vpop.f32.mrb[1].mxu0 }
  0xe1   :  { %102 = vst.msk [vmem:[#allocation2] sm:$0xff] %vm101_vm2, %v98_v11 }
  0xe2   :  { %156 = shalt.err (!%p153_p4)
}
  0xe3   :  { %s157_s27 = scalar_lea.hbm %s226_s3, 128 }
  0xe4   :  { %p158_p5 = scmp.ne.s32.totalorder %s226_s3, %s157_s27  ;;  %p161_p6 = scmp.lt.u32.totalorder %s157_s27, %s226_s3 }
  0xe6   :  { %p163_p7 = pnand %p161_p6, %p158_p5 }
  0xe8   :  { %166 = shalt.err (!%p163_p7)
}
  0xe9   :  { %112 = dma.vmem_to_hbm [thread:$0]  %s110_s1, 128, %s226_s3, [#allocation3]  }
  0xea   :  { %167 = dma.done.wait [#allocation3], 128  }
  0xeb   :  { %168 = vsyncadd [#allocation3], 4294967168 }
  0xec   :  { %116 = vsyncpa [#allocation3], 1 }

</bundles_post_ra>
